<compile_context>
chip_gen: v5e
topology: v5e:2x2
jax: 0.10.0
libtpu: 0.0.40
codegen_flags: <defaults>
</compile_context>

<pallas_src>
import jax
import jax.numpy as jnp
from jax.experimental import pallas as pl
from jax.experimental.pallas import tpu as pltpu


def _round_up(x: int, m: int) -> int:
    return ((x + m - 1) // m) * m


def _cdiv(a: int, b: int) -> int:
    return (a + b - 1) // b


# ---------------------------------------------------------------------------
# Kernels
# ---------------------------------------------------------------------------
def _logreg_sigmoid_kernel(x_ref, w_ref, b_ref, o_ref):
    # x_ref: (tb, N) VMEM   w_ref: (N, 1) VMEM   b_ref: (1,) SMEM   o_ref: (tb, 1)
    z = jnp.dot(x_ref[...], w_ref[...], preferred_element_type=jnp.float32)
    z = z + b_ref[0]                       # scalar bias from SMEM
    o_ref[...] = jax.nn.sigmoid(z).astype(o_ref.dtype)


def _logreg_softmax_kernel(x_ref, w_ref, b_ref, o_ref):
    # x_ref: (tb, N) VMEM   w_ref: (N, n_out) VMEM   b_ref: (1, n_out) VMEM
    z = jnp.dot(x_ref[...], w_ref[...], preferred_element_type=jnp.float32)
    z = z + b_ref[...]                     # broadcast (1, n_out) over batch
    o_ref[...] = jax.nn.softmax(z, axis=-1).astype(o_ref.dtype)


# ---------------------------------------------------------------------------
# Tile selection
# ---------------------------------------------------------------------------
_VMEM_BUDGET = 48 << 20       # fits v7x's 64 MiB/TC; tiny vs v5e/v6e's 128 MiB
_LANE = 128


def _pick_batch_tile(B: int, N: int, n_out: int, max_tb: int) -> int:
    lane_out = _round_up(n_out, _LANE)          # (tb, n_out) block is lane-padded
    per_row = 2 * (N + lane_out) * 4            # double-buffered x + output rows
    w_bytes = 2 * N * lane_out * 4              # resident weight block (padded)
    budget = _VMEM_BUDGET - (2 << 20) - w_bytes
    cap = max(8, (budget // per_row) // 8 * 8)  # keep footprint under the budget
    max_tb = max(8, min(max_tb, cap))

    num_tiles = _cdiv(B, max_tb)
    if num_tiles == 1 and B >= 512:
        num_tiles = 2                           # >=2 grid steps -> both v7x TCs busy
    # Balance tiles so the ragged last block is not nearly empty.
    tb = min(_round_up(_cdiv(B, num_tiles), 8), _round_up(B, 8))
    return tb


# ---------------------------------------------------------------------------
# Wrapper
# ---------------------------------------------------------------------------
def logistic_regression(x, w, b, *, max_tb: int = 4096):
    """x: (B, N) f32, w: (N, n_out) f32, b: (n_out,) f32 -> (B, n_out) f32."""
    B, N = x.shape
    n_out = w.shape[1]

    tb = _pick_batch_tile(B, N, n_out, max_tb)
    grid = (pl.cdiv(B, tb),)

    x_spec = pl.BlockSpec((tb, N), lambda i: (i, 0))
    w_spec = pl.BlockSpec((N, n_out), lambda i: (0, 0))     # VMEM-resident
    o_spec = pl.BlockSpec((tb, n_out), lambda i: (i, 0))

    if n_out == 1:
        kernel = _logreg_sigmoid_kernel
        b_arg = b.reshape(n_out).astype(jnp.float32)
        b_spec = pl.BlockSpec(memory_space=pltpu.SMEM)       # scalar bias in SMEM
    else:
        kernel = _logreg_softmax_kernel
        b_arg = b.reshape(1, n_out).astype(jnp.float32)
        b_spec = pl.BlockSpec((1, n_out), lambda i: (0, 0))

    lane_out = _round_up(n_out, _LANE)
    vmem_limit = int(min(
        max(2 * (tb * N + tb * lane_out + N * lane_out) * 4 + (2 << 20), 32 << 20),
        _VMEM_BUDGET))

    out = pl.pallas_call(
        kernel,
        out_shape=jax.ShapeDtypeStruct((B, n_out), jnp.float32),
        grid_spec=pltpu.PrefetchScalarGridSpec(
            num_scalar_prefetch=0,
            grid=grid,
            in_specs=[x_spec, w_spec, b_spec],
            out_specs=o_spec,
        ),
        compiler_params=pltpu.CompilerParams(
            # Batch tiles are independent -> shard across TCs on v7x; no-op on
            # single-TC v5e/v6e.
            dimension_semantics=("parallel",),
            vmem_limit_bytes=vmem_limit,
        ),
    )(x, w, b_arg)
    return out


if __name__ == "__main__":
    key = jax.random.PRNGKey(0)

    # --- Module defaults: n=512 features, n_out=1 -> Sigmoid scoring. ---
    B, N, N_OUT = 8, 512, 1
    kx, kw, kb = jax.random.split(key, 3)
    x = jax.random.normal(kx, (B, N), dtype=jnp.float32)
    bound = 1.0 / (N ** 0.5)  # torch.nn.Linear default init range
    w = jax.random.uniform(kw, (N, N_OUT), jnp.float32, -bound, bound)
    b = jax.random.uniform(kb, (N_OUT,), jnp.float32, -bound, bound)

    y = jax.block_until_ready(logistic_regression(x, w, b))
    y_ref = jax.nn.sigmoid(x @ w + b[None, :])
    assert y.shape == (B, N_OUT)
    assert jnp.allclose(y, y_ref, atol=1e-5, rtol=1e-5)

    # --- Non-multiple-of-tile batch: multi-step grid + masked ragged block. ---
    B2 = 13
    kx2 = jax.random.fold_in(key, 1)
    x2 = jax.random.normal(kx2, (B2, N), dtype=jnp.float32)
    y2 = jax.block_until_ready(logistic_regression(x2, w, b, max_tb=8))
    y2_ref = jax.nn.sigmoid(x2 @ w + b[None, :])
    assert y2.shape == (B2, N_OUT)
    assert jnp.allclose(y2, y2_ref, atol=1e-5, rtol=1e-5)

    # --- n_out > 1 -> Softmax scoring branch. ---
    N_OUT3 = 4
    kw3, kb3 = jax.random.split(jax.random.fold_in(key, 2))
    w3 = jax.random.uniform(kw3, (N, N_OUT3), jnp.float32, -bound, bound)
    b3 = jax.random.uniform(kb3, (N_OUT3,), jnp.float32, -bound, bound)
    y3 = jax.block_until_ready(logistic_regression(x, w3, b3))
    y3_ref = jax.nn.softmax(x @ w3 + b3[None, :], axis=-1)
    assert y3.shape == (B, N_OUT3)
    assert jnp.allclose(y3, y3_ref, atol=1e-5, rtol=1e-5)

    print("KERNEL_OK")
</pallas_src>

<mosaic_0001>
module attributes {stable_mosaic.version = 11 : i64} {
  func.func @_logreg_sigmoid_kernel(%arg0: i32, %arg1: memref<8x512xf32, #tpu.memory_space<vmem>>, %arg2: memref<512x1xf32, #tpu.memory_space<vmem>>, %arg3: memref<1xf32, #tpu.memory_space<smem>>, %arg4: memref<8x1xf32, #tpu.memory_space<vmem>>) attributes {dimension_semantics = [#tpu.dimension_semantics<parallel>], iteration_bounds = array<i64: 1>, scalar_prefetch = 0 : i64, scratch_operands = 0 : i64, tpu.core_type = #tpu.core_type<tc>, window_params = [{transform_indices = @transform_0, window_bounds = array<i64: 8, 512>}, {pipeline_mode = #tpu.pipeline_mode<synchronous>, transform_indices = @transform_1, window_bounds = array<i64: 512, 1>}, {transform_indices = @transform_2, window_bounds = array<i64: 1>}, {transform_indices = @transform_3, window_bounds = array<i64: 8, 1>}]} {
    %c0 = arith.constant 0 : index
    %c0_0 = arith.constant 0 : index
    %0 = vector.load %arg1[%c0, %c0_0] : memref<8x512xf32, #tpu.memory_space<vmem>>, vector<8x512xf32>
    %c0_1 = arith.constant 0 : index
    %c0_2 = arith.constant 0 : index
    %1 = vector.load %arg2[%c0_1, %c0_2] : memref<512x1xf32, #tpu.memory_space<vmem>>, vector<512x1xf32>
    %cst = arith.constant dense<0.000000e+00> : vector<8x1xf32>
    %2 = tpu.matmul %0, %1, %cst {dimension_numbers = #tpu.dot_dimension_numbers<[1], [0], [0], [1], [0, 0, 1, 1], [], []>} : vector<8x512xf32>, vector<512x1xf32>, vector<8x1xf32> -> vector<8x1xf32>
    %c0_3 = arith.constant 0 : index
    %3 = memref.load %arg3[%c0_3] : memref<1xf32, #tpu.memory_space<smem>>
    %4 = vector.broadcast %3 : f32 to vector<8x1xf32>
    %5 = arith.addf %2, %4 : vector<8x1xf32>
    %6 = arith.negf %5 : vector<8x1xf32>
    %7 = math.exp %6 : vector<8x1xf32>
    %cst_4 = arith.constant 1.000000e+00 : f32
    %8 = vector.broadcast %cst_4 : f32 to vector<8x1xf32>
    %9 = arith.addf %8, %7 : vector<8x1xf32>
    %10 = arith.divf %8, %9 : vector<8x1xf32>
    %c0_5 = arith.constant 0 : index
    %c0_6 = arith.constant 0 : index
    %11 = vector.load %arg4[%c0_5, %c0_6] : memref<8x1xf32, #tpu.memory_space<vmem>>, vector<8x1xf32>
    tpu.vector_store %arg4[%c0_5, %c0_6], %10 {strides = array<i32>} : memref<8x1xf32, #tpu.memory_space<vmem>>, vector<8x1xf32>,
    return
  }
  func.func @transform_0(%arg0: i32) -> (i32, i32) {
    %c0_i32 = arith.constant 0 : i32
    %c0_i32_0 = arith.constant 0 : i32
    return %arg0, %c0_i32 : i32, i32
  }
  func.func @transform_1(%arg0: i32) -> (i32, i32) {
    %c0_i32 = arith.constant 0 : i32
    %c0_i32_0 = arith.constant 0 : i32
    %c0_i32_1 = arith.constant 0 : i32
    return %c0_i32, %c0_i32_0 : i32, i32
  }
  func.func @transform_2(%arg0: i32) -> i32 {
    %c0_i32 = arith.constant 0 : i32
    %c0_i32_0 = arith.constant 0 : i32
    return %c0_i32 : i32
  }
  func.func @transform_3(%arg0: i32) -> (i32, i32) {
    %c0_i32 = arith.constant 0 : i32
    %c0_i32_0 = arith.constant 0 : i32
    return %arg0, %c0_i32 : i32, i32
  }
}

</mosaic_0001>

<bundles_post_ra>
// kernel: tpu_custom_call.1
= control target key start
LH: loop header
LB: loop body
LE: loop exit
PB: predicated region body
PF: predicated region fallthrough
CT: control target
= control target key end

     0   :  { %vm184_vm3 = vcmask 7168   ;;  %s425_s1 = inlined_call_operand.vmem [shape: f32[512,1], index: 1, kind: input, shape index: {}]   ;;  %s426_s0 = inlined_call_operand.vmem [shape: f32[8,512], index: 0, kind: input, shape index: {}]   ;;  %s427_s2 = inlined_call_operand.<no memory space> [shape: f32[1], index: 2, kind: input, shape index: {}]   ;;  %s428_s3 = inlined_call_operand.vmem [shape: f32[8,1], index: 3, kind: output, shape index: {}]  }
   0x1   :  { %v66_v0 = vld [vmem:[%s425_s1 + $0x178] sm:$0xff]  ;;  %v65_v2 = vld [vmem:[%s425_s1 + $0x170] sm:$0xff]  ;;  %v64_v6 = vld [vmem:[%s425_s1 + $0x168] sm:$0xff] }
   0x2   :  { %v34_v1 = vld [vmem:[%s425_s1 + $0x78] sm:$0xff]  ;;  %125 = vmatpush.msra.mxu2 %v66_v0  ;;  %v33_v4 = vld [vmem:[%s425_s1 + $0x70] sm:$0xff]  ;;  %v32_v8 = vld [vmem:[%s425_s1 + $0x68] sm:$0xff] }
   0x3   :  { %85 = vmatpush.msra.mxu0 %v34_v1  ;;  %v82_v3 = vld [vmem:[%s425_s1 + $0x1f8] sm:$0xff]  ;;  %v81_v7 = vld [vmem:[%s425_s1 + $0x1f0] sm:$0xff]  ;;  %v80_v10 = vld [vmem:[%s425_s1 + $0x1e8] sm:$0xff] }
   0x4   :  { %v50_v5 = vld [vmem:[%s425_s1 + $0xf8] sm:$0xff]  ;;  %145 = vmatpush.msra.mxu3 %v82_v3  ;;  %126 = vmatpush.msra.mxu2 %v65_v2  ;;  %v49_v9 = vld [vmem:[%s425_s1 + $0xf0] sm:$0xff]  ;;  %v63_v11 = vld [vmem:[%s425_s1 + $0x160] sm:$0xff] }
   0x5   :  { %105 = vmatpush.msra.mxu1 %v50_v5  ;;  %86 = vmatpush.msra.mxu0 %v33_v4  ;;  %v31_v12 = vld [vmem:[%s425_s1 + $0x60] sm:$0xff]  ;;  %v48_v13 = vld [vmem:[%s425_s1 + $0xe8] sm:$0xff]  ;;  %v62_v16 = vld [vmem:[%s425_s1 + $0x158] sm:$0xff]  ;;  %v84_v4 = vstv %s427_s2 }
   0x6   :  { %146 = vmatpush.msra.mxu3 %v81_v7  ;;  %127 = vmatpush.msra.mxu2 %v64_v6  ;;  %v79_v14 = vld [vmem:[%s425_s1 + $0x1e0] sm:$0xff]  ;;  %v30_v17 = vld [vmem:[%s425_s1 + $0x58] sm:$0xff]  ;;  %v61_v20 = vld [vmem:[%s425_s1 + $0x150] sm:$0xff] }
   0x7   :  { %106 = vmatpush.msra.mxu1 %v49_v9  ;;  %87 = vmatpush.msra.mxu0 %v32_v8  ;;  %v47_v15 = vld [vmem:[%s425_s1 + $0xe0] sm:$0xff]  ;;  %v78_v18 = vld [vmem:[%s425_s1 + $0x1d8] sm:$0xff]  ;;  %v29_v21 = vld [vmem:[%s425_s1 + $0x50] sm:$0xff] }
   0x8   :  { %147 = vmatpush.msra.mxu3 %v80_v10  ;;  %128 = vmatpush.msra.mxu2 %v63_v11  ;;  %v46_v19 = vld [vmem:[%s425_s1 + $0xd8] sm:$0xff]  ;;  %v77_v22 = vld [vmem:[%s425_s1 + $0x1d0] sm:$0xff]  ;;  %v60_v24 = vld [vmem:[%s425_s1 + $0x148] sm:$0xff] }
   0x9   :  { %107 = vmatpush.msra.mxu1 %v48_v13  ;;  %88 = vmatpush.msra.mxu0 %v31_v12  ;;  %v45_v23 = vld [vmem:[%s425_s1 + $0xd0] sm:$0xff]  ;;  %v28_v25 = vld [vmem:[%s425_s1 + $0x48] sm:$0xff]  ;;  %v59_v28 = vld [vmem:[%s425_s1 + $0x140] sm:$0xff] }
   0xa   :  { %148 = vmatpush.msra.mxu3 %v79_v14  ;;  %129 = vmatpush.msra.mxu2 %v62_v16  ;;  %v76_v26 = vld [vmem:[%s425_s1 + $0x1c8] sm:$0xff]  ;;  %v27_v29 = vld [vmem:[%s425_s1 + $0x40] sm:$0xff]  ;;  %v58_v32 = vld [vmem:[%s425_s1 + $0x138] sm:$0xff] }
   0xb   :  { %108 = vmatpush.msra.mxu1 %v47_v15  ;;  %89 = vmatpush.msra.mxu0 %v30_v17  ;;  %v44_v27 = vld [vmem:[%s425_s1 + $0xc8] sm:$0xff]  ;;  %v75_v30 = vld [vmem:[%s425_s1 + $0x1c0] sm:$0xff]  ;;  %v26_v33 = vld [vmem:[%s425_s1 + $0x38] sm:$0xff] }
   0xc   :  { %149 = vmatpush.msra.mxu3 %v78_v18  ;;  %130 = vmatpush.msra.mxu2 %v61_v20  ;;  %v43_v31 = vld [vmem:[%s425_s1 + $0xc0] sm:$0xff]  ;;  %v74_v34 = vld [vmem:[%s425_s1 + $0x1b8] sm:$0xff]  ;;  %v57_v36 = vld [vmem:[%s425_s1 + $0x130] sm:$0xff] }
   0xd   :  { %109 = vmatpush.msra.mxu1 %v46_v19  ;;  %90 = vmatpush.msra.mxu0 %v29_v21  ;;  %v42_v35 = vld [vmem:[%s425_s1 + $0xb8] sm:$0xff]  ;;  %v25_v37 = vld [vmem:[%s425_s1 + $0x30] sm:$0xff]  ;;  %v56_v40 = vld [vmem:[%s425_s1 + $0x128] sm:$0xff] }
   0xe   :  { %150 = vmatpush.msra.mxu3 %v77_v22  ;;  %131 = vmatpush.msra.mxu2 %v60_v24  ;;  %v73_v38 = vld [vmem:[%s425_s1 + $0x1b0] sm:$0xff]  ;;  %v24_v41 = vld [vmem:[%s425_s1 + $0x28] sm:$0xff]  ;;  %v55_v44 = vld [vmem:[%s425_s1 + $0x120] sm:$0xff] }
   0xf   :  { %110 = vmatpush.msra.mxu1 %v45_v23  ;;  %91 = vmatpush.msra.mxu0 %v28_v25  ;;  %v41_v39 = vld [vmem:[%s425_s1 + $0xb0] sm:$0xff]  ;;  %v72_v42 = vld [vmem:[%s425_s1 + $0x1a8] sm:$0xff]  ;;  %v23_v45 = vld [vmem:[%s425_s1 + $0x20] sm:$0xff] }
  0x10   :  { %151 = vmatpush.msra.mxu3 %v76_v26  ;;  %132 = vmatpush.msra.mxu2 %v59_v28  ;;  %v40_v43 = vld [vmem:[%s425_s1 + $0xa8] sm:$0xff]  ;;  %v71_v46 = vld [vmem:[%s425_s1 + $0x1a0] sm:$0xff]  ;;  %v54_v48 = vld [vmem:[%s425_s1 + $0x118] sm:$0xff] }
  0x11   :  { %111 = vmatpush.msra.mxu1 %v44_v27  ;;  %92 = vmatpush.msra.mxu0 %v27_v29  ;;  %v39_v47 = vld [vmem:[%s425_s1 + $0xa0] sm:$0xff]  ;;  %v22_v49 = vld [vmem:[%s425_s1 + $0x18] sm:$0xff]  ;;  %v53_v52 = vld [vmem:[%s425_s1 + $0x110] sm:$0xff] }
  0x12   :  { %152 = vmatpush.msra.mxu3 %v75_v30  ;;  %133 = vmatpush.msra.mxu2 %v58_v32  ;;  %v70_v50 = vld [vmem:[%s425_s1 + $0x198] sm:$0xff]  ;;  %v21_v53 = vld [vmem:[%s425_s1 + $0x10] sm:$0xff]  ;;  %v52_v56 = vld [vmem:[%s425_s1 + $0x108] sm:$0xff] }
  0x13   :  { %112 = vmatpush.msra.mxu1 %v43_v31  ;;  %93 = vmatpush.msra.mxu0 %v26_v33  ;;  %v38_v51 = vld [vmem:[%s425_s1 + $0x98] sm:$0xff]  ;;  %v69_v54 = vld [vmem:[%s425_s1 + $0x190] sm:$0xff]  ;;  %v20_v57 = vld [vmem:[%s425_s1 + $0x8] sm:$0xff] }
  0x14   :  { %153 = vmatpush.msra.mxu3 %v74_v34  ;;  %134 = vmatpush.msra.mxu2 %v57_v36  ;;  %v37_v55 = vld [vmem:[%s425_s1 + $0x90] sm:$0xff]  ;;  %v68_v58 = vld [vmem:[%s425_s1 + $0x188] sm:$0xff]  ;;  %v51_v60 = vld [vmem:[%s425_s1 + $0x100] sm:$0xff] }
  0x15   :  { %113 = vmatpush.msra.mxu1 %v42_v35  ;;  %94 = vmatpush.msra.mxu0 %v25_v37  ;;  %v36_v59 = vld [vmem:[%s425_s1 + $0x88] sm:$0xff]  ;;  %v19_v61 = vld [vmem:[%s425_s1] sm:$0xff]  ;;  %v17_v62 = vld [vmem:[%s426_s0 + $0x10] sm:$0xff] }
  0x16   :  { %154 = vmatpush.msra.mxu3 %v73_v38  ;;  %135 = vmatpush.msra.mxu2 %v56_v40  ;;  %v67_v63 = vld [vmem:[%s425_s1 + $0x180] sm:$0xff]  ;;  %v18_v1 = vld [vmem:[%s426_s0 + $0x18] sm:$0xff]  ;;  %v16_v3 = vld [vmem:[%s426_s0 + $0x8] sm:$0xff] }
  0x17   :  { %114 = vmatpush.msra.mxu1 %v41_v39  ;;  %95 = vmatpush.msra.mxu0 %v24_v41  ;;  %v15_v0 = vld [vmem:[%s426_s0] sm:$0xff] }
  0x18   :  { %155 = vmatpush.msra.mxu3 %v72_v42  ;;  %136 = vmatpush.msra.mxu2 %v55_v44  ;;  %v35_v2 = vld [vmem:[%s425_s1 + $0x80] sm:$0xff] }
  0x19   :  { %115 = vmatpush.msra.mxu1 %v40_v43  ;;  %96 = vmatpush.msra.mxu0 %v23_v45 }
  0x1a   :  { %156 = vmatpush.msra.mxu3 %v71_v46  ;;  %137 = vmatpush.msra.mxu2 %v54_v48 }
  0x1b   :  { %116 = vmatpush.msra.mxu1 %v39_v47  ;;  %97 = vmatpush.msra.mxu0 %v22_v49 }
  0x1c   :  { %157 = vmatpush.msra.mxu3 %v70_v50  ;;  %138 = vmatpush.msra.mxu2 %v53_v52 }
  0x1d   :  { %117 = vmatpush.msra.mxu1 %v38_v51  ;;  %98 = vmatpush.msra.mxu0 %v21_v53 }
  0x1e   :  { %158 = vmatpush.msra.mxu3 %v69_v54  ;;  %139 = vmatpush.msra.mxu2 %v52_v56 }
  0x1f   :  { %118 = vmatpush.msra.mxu1 %v37_v55  ;;  %99 = vmatpush.msra.mxu0 %v20_v57 }
  0x20   :  { %159 = vmatpush.msra.mxu3 %v68_v58  ;;  %140 = vmatpush.msra.mxu2 %v51_v60 }
  0x21   :  { %119 = vmatpush.msra.mxu1 %v36_v59  ;;  %100 = vmatpush.msra.mxu0 %v19_v61 }
  0x22   :  { %141 = vmatmul.f32.vlgmr.msra.gmra.mxu2 %v17_v62  ;;  %160 = vmatpush.msra.mxu3 %v67_v63 }
  0x23   :  { %101 = vmatmul.f32.vlgmr.msra.gmra.mxu0 %v15_v0  ;;  %161 = vmatmul.f32.vlgmr.msra.gmra.mxu3 %v18_v1 }
  0x24   :  { %120 = vmatpush.msra.mxu1 %v35_v2 }
  0x25   :  { %121 = vmatmul.f32.vlgmr.msra.gmra.mxu1 %v16_v3 }
  0xa0   :  { %v102_v5 = vpop.f32.mrf.mxu0 }
  0xa1   :  { %v103_v6 = vadd.f32 %v102_v5, %v84_v4 }
  0xa2   :  { %v122_v7 = vpop.f32.mrf.mxu1 }
  0xa3   :  { %v123_v8 = vadd.f32 %v122_v7, %v103_v6 }
  0xa5   :  { %v142_v9 = vpop.f32.mrf.mxu2 }
  0xa6   :  { %v143_v10 = vadd.f32 %v142_v9, %v123_v8  ;;  %v162_v11 = vpop.f32.mrf.mxu3 }
  0xa8   :  { %v163_v12 = vadd.f32 %v162_v11, %v143_v10 }
  0xaa   :  { %v190_v13 = vmul.f32 -1.442695, %v163_v12 }
  0xac   :  { %191 = vpow2.f32 %v190_v13 }
  0xb2   :  { %v192_v14 = vpop.eup %191 }
  0xb3   :  { %v168_v15 = vadd.f32 1.0, %v192_v14 }
  0xb5   :  { %193 = vrcp.f32 %v168_v15  ;;  %v180_v19 = vand.u32 2147483648, %v168_v15  ;;  %v178_v21 = vand.u32 2147483647, %v168_v15  ;;  %vm174_vm1 = vweird.f32 %v168_v15 }
  0xb7   :  { %v181_v23 = vor.u32 1.1754944e-38, %v180_v19  ;;  %vm179_vm4 = vcmp.eq.f32.partialorder %v178_v21, 8.507059e+37 }
  0xbb   :  { %v194_v16 = vpop.eup %193 }
  0xbc   :  { %v170_v17 = vmul.f32 %v194_v16, %v168_v15  ;;  %vm175_vm0 = vweird.f32 %v194_v16 }
  0xbd   :  { %vm176_vm2 = vmor %vm174_vm1, %vm175_vm0 }
  0xbe   :  { %v171_v18 = vsub.f32 1.0, %v170_v17 }
  0xc0   :  { %v172_v20 = vmul.f32 %v194_v16, %v171_v18 }
  0xc2   :  { %v173_v22 = vadd.f32 %v194_v16, %v172_v20 }
  0xc4   :  { %v177_v24 = vsel %vm176_vm2, %v194_v16, %v173_v22 }
  0xc5   :  { %v182_v25 = vsel %vm179_vm4, %v181_v23, %v177_v24 }
  0xc6   :  { %185 = vst.msk [vmem:[%s428_s3] sm:$0xff] %vm184_vm3, %v182_v25 }

</bundles_post_ra>
